<compile_context>
chip_gen: v7x
topology: tpu7x:2x2x1
jax: 0.10.0
libtpu: 0.0.40
codegen_flags: <defaults>
</compile_context>

<pallas_src>
import functools

import jax
import jax.numpy as jnp
from jax.experimental import pallas as pl
from jax.experimental.pallas import tpu as pltpu

FEATURES = 5
LANE_GRAIN = 512     # pad & tile granule: multiple of 256 (MXU pass) and 128 (vreg lanes)
MAX_TILE_B = 65536   # (8, 65536) f32 = 2 MiB per VMEM buffer after sublane padding
TARGET_STEPS = 8     # >= 2 so the v7x megacore splits the parallel axis; 8 keeps the
                     # pipeline busy per core without shrinking tiles below ~8K lanes
_VMEM_LIMIT_BYTES = 32 * 1024 * 1024   # explicit scoped-VMEM budget (safe on v5e/v6e/v7x)


def _round_up(n, m):
    return ((n + m - 1) // m) * m


def _fused_affine_kernel(xT_ref, wT_ref, b_ref, oT_ref):
    """o^T = W_eff^T @ x^T + b_eff  — one MXU push + bias add, lane-dense in/out."""
    acc = jnp.dot(wT_ref[...], xT_ref[...], preferred_element_type=jnp.float32)
    # (5,1) bias broadcast over the lane axis; hidden under the tile DMA (DMA-bound).
    oT_ref[...] = (acc + b_ref[...]).astype(oT_ref.dtype)


def _fold_affine(layers):
    """Fold torch-layout Linear layers (w:(out,in), b:(out,)) into one affine map.

    Returns W_eff (in, out) and b_eff (out,) in f32 so the single-matmul result stays
    within ~1e-5 of the unfused f32 chain.
    """
    f = layers[0][0].shape[1]
    W_eff = jnp.eye(f, dtype=jnp.float32)
    b_eff = jnp.zeros((f,), dtype=jnp.float32)
    for w, b in layers:
        wt = w.astype(jnp.float32).T               # (in, out)
        W_eff = W_eff @ wt
        b_eff = b_eff @ wt + b.astype(jnp.float32)
    return W_eff, b_eff


def _choose_tiling(batch):
    """Pick (tile_b, grid, b_pad): tile multiple of 512, <= MAX_TILE_B, >= TARGET_STEPS
    grid steps when the batch allows, pad waste bounded (decoupled from max tile)."""
    b512 = _round_up(batch, LANE_GRAIN)
    steps = max(pl.cdiv(b512, MAX_TILE_B), min(TARGET_STEPS, b512 // LANE_GRAIN))
    tile_b = _round_up(pl.cdiv(b512, steps), LANE_GRAIN)
    grid0 = pl.cdiv(b512, tile_b)
    b_pad = grid0 * tile_b
    return tile_b, grid0, b_pad


def _fused_affine_pallas(xT, wT, b_col, tile_b, grid0):
    """xT: (F, b_pad) lane-dense, b_pad == grid0 * tile_b. Returns (F, b_pad)."""
    f, b_pad = xT.shape
    assert b_pad == grid0 * tile_b
    itemsize = jnp.dtype(xT.dtype).itemsize
    cost = pl.CostEstimate(
        flops=2 * f * f * b_pad,
        transcendentals=0,
        bytes_accessed=2 * f * b_pad * itemsize + wT.size * wT.dtype.itemsize
        + b_col.size * b_col.dtype.itemsize,
    )
    return pl.pallas_call(
        _fused_affine_kernel,
        out_shape=jax.ShapeDtypeStruct((f, b_pad), xT.dtype),
        grid_spec=pltpu.PrefetchScalarGridSpec(
            num_scalar_prefetch=0,
            grid=(grid0,),
            in_specs=[
                pl.BlockSpec((f, tile_b), lambda i: (0, i)),   # x^T tile (lane-dense)
                pl.BlockSpec((f, f), lambda i: (0, 0)),        # fused weight (resident)
                pl.BlockSpec((f, 1), lambda i: (0, 0)),        # fused bias (resident)
            ],
            out_specs=pl.BlockSpec((f, tile_b), lambda i: (0, i)),
        ),
        compiler_params=pltpu.CompilerParams(
            dimension_semantics=("parallel",),
            vmem_limit_bytes=_VMEM_LIMIT_BYTES,
        ),
        cost_estimate=cost,
    )(xT, wT, b_col)


def _live_affine(params):
    """Live data path only: outer0 -> seq0 -> seq1 -> seq0 -> seq1 -> outer2."""
    live = [
        (params["outer0_w"], params["outer0_b"]),
        (params["seq0_w"], params["seq0_b"]),
        (params["seq1_w"], params["seq1_b"]),
        (params["seq0_w"], params["seq0_b"]),
        (params["seq1_w"], params["seq1_b"]),
        (params["outer2_w"], params["outer2_b"]),
    ]
    return _fold_affine(live)   # W_eff (in,out), b_eff (out,)


def container_forward_lane_dense(xT, params):
    """Primary API. xT: (5, B) feature-major (batch on the 128-lane axis).

    Zero wrapper-side layout passes when B % 512 == 0; otherwise a single small pad.
    Keep activations in this layout across surrounding ops to stay at one HBM pass
    per module (perf-review item 1a).
    """
    f, batch = xT.shape
    assert f == FEATURES
    W_eff, b_eff = _live_affine(params)
    tile_b, grid0, b_pad = _choose_tiling(batch)
    if b_pad != batch:
        xT = jnp.pad(xT, ((0, 0), (0, b_pad - batch)))
    wT = jnp.transpose(W_eff).astype(xT.dtype)      # (5,5): o^T = W_eff^T @ x^T
    b_col = b_eff.reshape(f, 1)                     # f32 bias, broadcast over lanes
    outT = _fused_affine_pallas(xT, wT, b_col, tile_b, grid0)
    return outT[:, :batch] if b_pad != batch else outT


def container_forward(x, params):
    """Torch-contract adapter: x (B, 5) -> out (B, 5).

    The two boundary transposes each cost an extra HBM pass; they are inherent to the
    (B, 5) contract. In a real pipeline, feed `container_forward_lane_dense` directly.
    """
    batch, f = x.shape
    assert f == FEATURES
    outT = container_forward_lane_dense(jnp.transpose(x), params)
    return jnp.transpose(outT)


def _torch_linear_init(key, out_features, in_features, dtype=jnp.float32):
    """Deterministic init mimicking torch.nn.Linear default (uniform +-1/sqrt(in))."""
    kw, kb = jax.random.split(key)
    bound = 1.0 / (in_features ** 0.5)
    w = jax.random.uniform(kw, (out_features, in_features), dtype,
                           minval=-bound, maxval=bound)
    b = jax.random.uniform(kb, (out_features,), dtype,
                           minval=-bound, maxval=bound)
    return w, b


def _reference_forward(x, p):
    """Pure-JAX transcription of the full PyTorch forward, dead code included."""
    def lin(v, w, b):
        return v @ w.T + b

    # ContainerModule layer 0
    out = lin(x, p["outer0_w"], p["outer0_b"])
    # ContainerChildModule
    cx = out
    c = lin(lin(cx, p["seq0_w"], p["seq0_b"]), p["seq1_w"], p["seq1_b"])   # seq(x)
    c = lin(c, p["between_w"], p["between_b"])                             # between (dead)
    c = lin(lin(c, p["seq0_w"], p["seq0_b"]), p["seq1_w"], p["seq1_b"])    # loop (dead)
    c = lin(lin(cx, p["seq0_w"], p["seq0_b"]), p["seq1_w"], p["seq1_b"])   # seq(x), overwrites
    c = lin(lin(c, p["seq0_w"], p["seq0_b"]), p["seq1_w"], p["seq1_b"])    # loop (live)
    # ContainerModule layer 2 (layer 3 is None -> skipped)
    return lin(c, p["outer2_w"], p["outer2_b"])


if __name__ == "__main__":
    key = jax.random.PRNGKey(0)
    kx, kx2, k0, k1, k2, k3, k4 = jax.random.split(key, 7)

    F = FEATURES
    p = {}
    p["outer0_w"], p["outer0_b"] = _torch_linear_init(k0, F, F)
    p["seq0_w"], p["seq0_b"] = _torch_linear_init(k1, F, F)
    p["seq1_w"], p["seq1_b"] = _torch_linear_init(k2, F, F)
    p["between_w"], p["between_b"] = _torch_linear_init(k3, F, F)   # dead in forward
    p["outer2_w"], p["outer2_b"] = _torch_linear_init(k4, F, F)

    fwd = jax.jit(functools.partial(container_forward, params=p))

    # Small shape matching the module contract (batch=8, features=5): single-tile path.
    B1 = 8
    x1 = jax.random.normal(kx, (B1, F), jnp.float32)
    out1 = jax.block_until_ready(fwd(x1))
    ref1 = _reference_forward(x1, p)
    assert out1.shape == (B1, F)
    assert jnp.allclose(out1, ref1, atol=1e-4, rtol=1e-4), "mismatch vs reference (B=8)"

    # Second shape exercising a multi-step grid and the ragged-tail padding/slicing.
    B2 = 1030
    x2 = jax.random.normal(kx2, (B2, F), jnp.float32)
    out2 = jax.block_until_ready(container_forward(x2, p))
    ref2 = _reference_forward(x2, p)
    assert out2.shape == (B2, F)
    assert jnp.allclose(out2, ref2, atol=1e-4, rtol=1e-4), "mismatch vs reference (B=1030)"

    print("KERNEL_OK")
</pallas_src>

<mosaic_0001>
module attributes {stable_mosaic.version = 11 : i64} {
  func.func @_fused_affine_kernel(%arg0: i32, %arg1: memref<5x512xf32, #tpu.memory_space<vmem>>, %arg2: memref<5x5xf32, #tpu.memory_space<vmem>>, %arg3: memref<5x1xf32, #tpu.memory_space<vmem>>, %arg4: memref<5x512xf32, #tpu.memory_space<vmem>>) attributes {dimension_semantics = [#tpu.dimension_semantics<parallel>], iteration_bounds = array<i64: 1>, scalar_prefetch = 0 : i64, scratch_operands = 0 : i64, tpu.core_type = #tpu.core_type<tc>, window_params = [{transform_indices = @transform_0, window_bounds = array<i64: 5, 512>}, {pipeline_mode = #tpu.pipeline_mode<synchronous>, transform_indices = @transform_1, window_bounds = array<i64: 5, 5>}, {pipeline_mode = #tpu.pipeline_mode<synchronous>, transform_indices = @transform_2, window_bounds = array<i64: 5, 1>}, {transform_indices = @transform_3, window_bounds = array<i64: 5, 512>}]} {
    %c0 = arith.constant 0 : index
    %c0_0 = arith.constant 0 : index
    %0 = vector.load %arg2[%c0, %c0_0] : memref<5x5xf32, #tpu.memory_space<vmem>>, vector<5x5xf32>
    %c0_1 = arith.constant 0 : index
    %c0_2 = arith.constant 0 : index
    %1 = vector.load %arg1[%c0_1, %c0_2] : memref<5x512xf32, #tpu.memory_space<vmem>>, vector<5x512xf32>
    %cst = arith.constant dense<0.000000e+00> : vector<5x512xf32>
    %2 = tpu.matmul %0, %1, %cst {dimension_numbers = #tpu.dot_dimension_numbers<[1], [0], [0], [1], [0, 0, 1, 1], [], []>} : vector<5x5xf32>, vector<5x512xf32>, vector<5x512xf32> -> vector<5x512xf32>
    %c0_3 = arith.constant 0 : index
    %c0_4 = arith.constant 0 : index
    %3 = vector.load %arg3[%c0_3, %c0_4] : memref<5x1xf32, #tpu.memory_space<vmem>>, vector<5x1xf32>
    %4 = vector.broadcast %3 : vector<5x1xf32> to vector<5x512xf32>
    %5 = arith.addf %2, %4 : vector<5x512xf32>
    %c0_5 = arith.constant 0 : index
    %c0_6 = arith.constant 0 : index
    %6 = vector.load %arg4[%c0_5, %c0_6] : memref<5x512xf32, #tpu.memory_space<vmem>>, vector<5x512xf32>
    tpu.vector_store %arg4[%c0_5, %c0_6], %5 {strides = array<i32>} : memref<5x512xf32, #tpu.memory_space<vmem>>, vector<5x512xf32>,
    return
  }
  func.func @transform_0(%arg0: i32) -> (i32, i32) {
    %c0_i32 = arith.constant 0 : i32
    %c0_i32_0 = arith.constant 0 : i32
    return %c0_i32, %arg0 : i32, i32
  }
  func.func @transform_1(%arg0: i32) -> (i32, i32) {
    %c0_i32 = arith.constant 0 : i32
    %c0_i32_0 = arith.constant 0 : i32
    %c0_i32_1 = arith.constant 0 : i32
    return %c0_i32, %c0_i32_0 : i32, i32
  }
  func.func @transform_2(%arg0: i32) -> (i32, i32) {
    %c0_i32 = arith.constant 0 : i32
    %c0_i32_0 = arith.constant 0 : i32
    %c0_i32_1 = arith.constant 0 : i32
    return %c0_i32, %c0_i32_0 : i32, i32
  }
  func.func @transform_3(%arg0: i32) -> (i32, i32) {
    %c0_i32 = arith.constant 0 : i32
    %c0_i32_0 = arith.constant 0 : i32
    return %c0_i32, %arg0 : i32, i32
  }
}

</mosaic_0001>

<bundles_post_ra>
// kernel: container_forward.1
= control target key start
LH: loop header
LB: loop body
LE: loop exit
PB: predicated region body
PF: predicated region fallthrough
CT: control target
= control target key end

     0   :  { %vm29_vm0 = vcmask 1044480   ;;  %vm25_vm1 = vcmask 39936   ;;  %v201_v3 = vmov 0.0   ;;  %v202_v7 = vmov 0   ;;  %s255_s0 = inlined_call_operand.vmem [shape: f32[5,512], index: 0, kind: input, shape index: {}]   ;;  %s256_s1 = inlined_call_operand.vmem [shape: f32[5,5], index: 1, kind: input, shape index: {}]   ;;  %s257_s2 = inlined_call_operand.vmem [shape: f32[5,1], index: 2, kind: input, shape index: {}]   ;;  %s258_s3 = inlined_call_operand.vmem [shape: f32[5,512], index: 3, kind: output, shape index: {}]  }
   0x1   :  { %v16_v0 = vld [vmem:[%s255_s0 + $0x8] sm:$0x1f]  ;;  %v18_v1 = vld [vmem:[%s255_s0 + $0x18] sm:$0x1f]  ;;  %v15_v2 = vld [vmem:[%s255_s0] sm:$0x1f]  ;;  %106 = vmatprep.mubr.f32.mxu0 %v201_v3  ;;  %177 = vmatprep.mubr.f32.mxu1 %v201_v3 }
   0x2   :  { %192 = vmatprep.subr.msk.mxu0 %vm29_vm0, %v16_v0  ;;  %195 = vmatprep.subr.msk.mxu1 %vm29_vm0, %v18_v1  ;;  %v17_v4 = vld [vmem:[%s255_s0 + $0x10] sm:$0x1f]  ;;  %v14_v5 = vld [vmem:[%s256_s1] sm:$0x1f] }
   0x3   :  { %193 = vmatpush1.msk.msra.mxu0 %vm29_vm0, %v15_v2  ;;  %196 = vmatpush1.msk.msra.mxu1 %vm29_vm0, %v17_v4  ;;  %v19_v6 = vld [vmem:[%s257_s2] sm:$0x1f] }
   0x4   :  { %194 = vmatmul.mubr.msk.f32.vlgmr.msra.gmra.mrb[0].mxu0 %vm25_vm1, %v14_v5  ;;  %197 = vmatmul.mubr.msk.f32.vlgmr.msra.gmra.mrb[0].mxu1 %vm25_vm1, %v14_v5 }
   0x5   :  { %200 = vset.pattern.permute.xlu0 %v202_v7 }
   0x6   :  { %22 = vperm.xlu0 %200, %v19_v6  }
  0x85   :  { %v23_v8 = vpop.permute.xlu0 %22 }
  0xd7   :  { %v108_v9 = vpop.f32.mrb[0].mxu0  ;;  %v179_v10 = vpop.f32.mrb[0].mxu1 }
  0xd8   :  { %v109_v11 = vadd.f32 %v108_v9, %v23_v8  ;;  %v180_v12 = vadd.f32 %v179_v10, %v23_v8  ;;  %v110_v13 = vpop.f32.mrb[1].mxu0  ;;  %v181_v14 = vpop.f32.mrb[1].mxu1 }
  0xd9   :  { %v111_v15 = vadd.f32 %v110_v13, %v23_v8  ;;  %v182_v16 = vadd.f32 %v181_v14, %v23_v8 }
  0xda   :  { %184 = vst [vmem:[%s258_s3] sm:$0x1f] %v109_v11  ;;  %186 = vst [vmem:[%s258_s3 + $0x10] sm:$0x1f] %v180_v12 }
  0xdb   :  { %185 = vst [vmem:[%s258_s3 + $0x8] sm:$0x1f] %v111_v15  ;;  %187 = vst [vmem:[%s258_s3 + $0x18] sm:$0x1f] %v182_v16 }

</bundles_post_ra>
